<compile_context>
chip_gen: v5e
topology: v5e:2x2
jax: 0.10.0
libtpu: 0.0.40
codegen_flags: <defaults>
</compile_context>

<pallas_src>
import functools
import math

import jax
import jax.numpy as jnp
from jax import lax
from jax.experimental import pallas as pl
from jax.experimental.pallas import tpu as pltpu

# ---- module configuration (synthetic, deterministic) -----------------------
RADIAL_CUTOFF = 0.5      # nanometers (modelforge internal unit), radial_cutoff
N_RBF = 16               # number_of_radial_basis_functions (must divide 128)
MAX_Z = 101              # featurization_config["maximum_atomic_number"]
N_FEATURES = 32          # featurization_config["number_of_per_atom_features"]
MAX_Z_PADDED = 128       # pad embedding rows up to the TPU lane width


# ---------------------------------------------------------------------------
# Fused kernel: Gaussian RBF (lane-packed) + cosine cutoff (lane-dense)
#               + atomic-number embedding (one-hot @ table on the MXU).
# ---------------------------------------------------------------------------
def _schnet_rep_kernel(d_rep_ref, centers_ref, d_lane_ref, z_ref, table_ref,
                       f_ij_ref, f_cut_ref, emb_ref,
                       *, rbf_coeff, cut_coeff, cutoff):
    # --- radial symmetry functions, lane-dense -----------------------------
    # d_rep rows hold `pack` pairs, each repeated n_rbf times; centers are tiled to match,
    # so diff lane (j*n_rbf + k) of row r is d_{r*pack+j} - mu_k.
    diff = d_rep_ref[...] - centers_ref[...]                 # [rows, 128]
    f_ij_ref[...] = jnp.exp(rbf_coeff * (diff * diff))       # EUP, all 128 lanes valid

    # --- cosine attenuation, pairs on the lane axis -------------------------
    dl = d_lane_ref[...]                                     # [rows_cut, 128]
    att = 0.5 * (jnp.cos(cut_coeff * dl) + 1.0)
    f_cut_ref[...] = jnp.where(dl < cutoff, att, 0.0)

    # --- FeaturizeInput (atomic-number embedding) ---------------------------
    # Tiny one-hot matmul; recomputed every grid step, each step writes its OWN
    # output block (index_map varies with the grid index), so no revisit/race even
    # when the parallel axis is sharded across TensorCores.
    z = z_ref[...]                                           # [N, 1] int32
    zp = table_ref.shape[0]                                  # padded vocab (128)
    col = lax.broadcasted_iota(jnp.int32, (z.shape[0], zp), 1)
    onehot = (col == z).astype(jnp.float32)                  # [N, Zp]
    emb_ref[0, :, :] = jnp.dot(onehot, table_ref[...],
                               preferred_element_type=jnp.float32)


# ---------------------------------------------------------------------------
# Wrapper
# ---------------------------------------------------------------------------
def schnet_representation(d_ij, atomic_numbers, embedding_table, centers,
                          *, cutoff=RADIAL_CUTOFF, tile_pairs=1024):
    P = d_ij.shape[0]
    n_rbf = centers.shape[-1]
    assert 128 % n_rbf == 0, "n_rbf must divide the 128-lane width for packing"
    pack = 128 // n_rbf                       # pairs packed per lane-row of f_ij
    assert tile_pairs % (pack * 128) == 0 and tile_pairs % 1024 == 0

    n_atoms = atomic_numbers.shape[0]
    zp, n_feat = embedding_table.shape

    # Fold the RBF / cutoff constants (one VPU multiply saved per element).
    width = cutoff / n_rbf                    # SchnetRadialBasisFunction radial scale factor
    rbf_coeff = -0.5 / (width * width)
    cut_coeff = math.pi / cutoff

    # Pad the pair axis to a whole number of tiles; pad distances with `cutoff`
    # so padded lanes produce finite values (and f_cutoff == 0) before being dropped.
    n_steps = int(pl.cdiv(P, tile_pairs))
    P_pad = n_steps * tile_pairs
    d_flat = d_ij.reshape(-1).astype(jnp.float32)
    if P_pad != P:
        d_flat = jnp.concatenate(
            [d_flat, jnp.full((P_pad - P,), cutoff, jnp.float32)])

    # Lane-dense views built in the wrapper (layout plumbing, not compute).
    d_rep = jnp.repeat(d_flat.reshape(P_pad // pack, pack), n_rbf, axis=1)   # [P/8, 128]
    d_lane = d_flat.reshape(P_pad // 128, 128)                               # [P/128, 128]
    centers_tiled = jnp.tile(centers.reshape(1, n_rbf), (1, pack))           # [1, 128]
    z2d = atomic_numbers.reshape(n_atoms, 1).astype(jnp.int32)

    rows_fij = tile_pairs // pack             # packed f_ij rows per grid step
    rows_cut = tile_pairs // 128              # cutoff rows per grid step

    f_ij_p, f_cut_p, emb_all = pl.pallas_call(
        functools.partial(_schnet_rep_kernel,
                          rbf_coeff=rbf_coeff, cut_coeff=cut_coeff, cutoff=cutoff),
        out_shape=(
            jax.ShapeDtypeStruct((P_pad // pack, 128), jnp.float32),
            jax.ShapeDtypeStruct((P_pad // 128, 128), jnp.float32),
            jax.ShapeDtypeStruct((n_steps, n_atoms, n_feat), jnp.float32),
        ),
        grid_spec=pltpu.PrefetchScalarGridSpec(
            num_scalar_prefetch=0,
            grid=(n_steps,),
            in_specs=[
                pl.BlockSpec((rows_fij, 128), lambda i: (i, 0)),      # d_rep
                pl.BlockSpec((1, 128), lambda i: (0, 0)),             # centers (resident)
                pl.BlockSpec((rows_cut, 128), lambda i: (i, 0)),      # d_lane
                pl.BlockSpec((n_atoms, 1), lambda i: (0, 0)),         # atomic numbers
                pl.BlockSpec((zp, n_feat), lambda i: (0, 0)),         # embedding table
            ],
            out_specs=(
                pl.BlockSpec((rows_fij, 128), lambda i: (i, 0)),      # packed f_ij
                pl.BlockSpec((rows_cut, 128), lambda i: (i, 0)),      # packed f_cutoff
                pl.BlockSpec((1, n_atoms, n_feat), lambda i: (i, 0, 0)),  # per-step embedding
            ),
        ),
        compiler_params=pltpu.CompilerParams(dimension_semantics=("parallel",)),
    )(d_rep, centers_tiled, d_lane, z2d, embedding_table)

    f_ij = f_ij_p.reshape(P_pad, n_rbf)[:P]
    f_cutoff = f_cut_p.reshape(P_pad, 1)[:P]
    atomic_embedding = emb_all[0]

    return {"f_ij": f_ij, "f_cutoff": f_cutoff, "atomic_embedding": atomic_embedding}


# ---------------------------------------------------------------------------
if __name__ == "__main__":
    key = jax.random.PRNGKey(0)
    k_d, k_z, k_w = jax.random.split(key, 3)

    num_pairs = 2048        # 2 grid steps of 1024 pairs -> both TensorCores busy on v7x
    num_atoms = 8

    # Pairwise distances d_ij: [num_pairs, 1], some beyond the cutoff to exercise masking.
    d_ij = jax.random.uniform(k_d, (num_pairs, 1), jnp.float32,
                              minval=0.0, maxval=RADIAL_CUTOFF * 1.2)

    # Atomic numbers: [num_atoms] int32 in [1, MAX_Z).
    atomic_numbers = jax.random.randint(k_z, (num_atoms,), 1, MAX_Z, jnp.int32)

    # Deterministic nn.Embedding-style weights; rows >= MAX_Z are zero padding to lane width.
    # NOTE: atomic_number >= MAX_Z_PADDED would yield a zero row instead of raising
    # (torch nn.Embedding would error) — acceptable given the zero-padded table.
    table = jax.random.normal(k_w, (MAX_Z, N_FEATURES), jnp.float32)
    table_padded = jnp.zeros((MAX_Z_PADDED, N_FEATURES), jnp.float32).at[:MAX_Z].set(table)

    # RBF centers: linspace(0, cutoff, n_rbf).
    centers = jnp.linspace(0.0, RADIAL_CUTOFF, N_RBF, dtype=jnp.float32).reshape(1, N_RBF)

    out = schnet_representation(d_ij, atomic_numbers, table_padded, centers)
    out = jax.block_until_ready(out)

    # Shape checks against the module semantics.
    assert out["f_ij"].shape == (num_pairs, N_RBF)
    assert out["f_cutoff"].shape == (num_pairs, 1)
    assert out["atomic_embedding"].shape == (num_atoms, N_FEATURES)

    # Cross-check against a pure-JAX reference.
    width = RADIAL_CUTOFF / N_RBF
    ref_f_ij = jnp.exp(-0.5 * ((d_ij - centers) / width) ** 2)
    ref_cut = jnp.where(d_ij < RADIAL_CUTOFF,
                        0.5 * (jnp.cos(jnp.pi * d_ij / RADIAL_CUTOFF) + 1.0), 0.0)
    ref_emb = table_padded[atomic_numbers]
    assert jnp.allclose(out["f_ij"], ref_f_ij, atol=1e-5)
    assert jnp.allclose(out["f_cutoff"], ref_cut, atol=1e-5)
    assert jnp.allclose(out["atomic_embedding"], ref_emb, atol=1e-5)

    print("KERNEL_OK")
</pallas_src>

<mosaic_0001>
module attributes {stable_mosaic.version = 11 : i64} {
  func.func @_schnet_rep_kernel(%arg0: i32, %arg1: memref<128x128xf32, #tpu.memory_space<vmem>>, %arg2: memref<1x128xf32, #tpu.memory_space<vmem>>, %arg3: memref<8x128xf32, #tpu.memory_space<vmem>>, %arg4: memref<8x1xi32, #tpu.memory_space<vmem>>, %arg5: memref<128x32xf32, #tpu.memory_space<vmem>>, %arg6: memref<128x128xf32, #tpu.memory_space<vmem>>, %arg7: memref<8x128xf32, #tpu.memory_space<vmem>>, %arg8: memref<1x8x32xf32, #tpu.memory_space<vmem>>) attributes {dimension_semantics = [#tpu.dimension_semantics<parallel>], iteration_bounds = array<i64: 2>, scalar_prefetch = 0 : i64, scratch_operands = 0 : i64, tpu.core_type = #tpu.core_type<tc>, window_params = [{transform_indices = @transform_0, window_bounds = array<i64: 128, 128>}, {pipeline_mode = #tpu.pipeline_mode<synchronous>, transform_indices = @transform_1, window_bounds = array<i64: 1, 128>}, {transform_indices = @transform_2, window_bounds = array<i64: 8, 128>}, {pipeline_mode = #tpu.pipeline_mode<synchronous>, transform_indices = @transform_3, window_bounds = array<i64: 8, 1>}, {pipeline_mode = #tpu.pipeline_mode<synchronous>, transform_indices = @transform_4, window_bounds = array<i64: 128, 32>}, {transform_indices = @transform_5, window_bounds = array<i64: 128, 128>}, {transform_indices = @transform_6, window_bounds = array<i64: 8, 128>}, {transform_indices = @transform_7, window_bounds = array<i64: 1, 8, 32>}]} {
    %c0 = arith.constant 0 : index
    %c0_0 = arith.constant 0 : index
    %0 = vector.load %arg1[%c0, %c0_0] : memref<128x128xf32, #tpu.memory_space<vmem>>, vector<128x128xf32>
    %c0_1 = arith.constant 0 : index
    %c0_2 = arith.constant 0 : index
    %1 = vector.load %arg2[%c0_1, %c0_2] : memref<1x128xf32, #tpu.memory_space<vmem>>, vector<1x128xf32>
    %2 = vector.broadcast %1 : vector<1x128xf32> to vector<128x128xf32>
    %3 = arith.subf %0, %2 : vector<128x128xf32>
    %4 = arith.mulf %3, %3 : vector<128x128xf32>
    %cst = arith.constant -5.120000e+02 : f32
    %5 = vector.broadcast %cst : f32 to vector<128x128xf32>
    %6 = arith.mulf %5, %4 : vector<128x128xf32>
    %7 = math.exp %6 : vector<128x128xf32>
    %c0_3 = arith.constant 0 : index
    %c0_4 = arith.constant 0 : index
    %8 = vector.load %arg6[%c0_3, %c0_4] : memref<128x128xf32, #tpu.memory_space<vmem>>, vector<128x128xf32>
    tpu.vector_store %arg6[%c0_3, %c0_4], %7 {strides = array<i32>} : memref<128x128xf32, #tpu.memory_space<vmem>>, vector<128x128xf32>,
    %c0_5 = arith.constant 0 : index
    %c0_6 = arith.constant 0 : index
    %9 = vector.load %arg3[%c0_5, %c0_6] : memref<8x128xf32, #tpu.memory_space<vmem>>, vector<8x128xf32>
    %cst_7 = arith.constant 6.28318548 : f32
    %10 = vector.broadcast %cst_7 : f32 to vector<8x128xf32>
    %11 = arith.mulf %10, %9 : vector<8x128xf32>
    %12 = math.cos %11 : vector<8x128xf32>
    %cst_8 = arith.constant 1.000000e+00 : f32
    %13 = vector.broadcast %cst_8 : f32 to vector<8x128xf32>
    %14 = arith.addf %12, %13 : vector<8x128xf32>
    %cst_9 = arith.constant 5.000000e-01 : f32
    %15 = vector.broadcast %cst_9 : f32 to vector<8x128xf32>
    %16 = arith.mulf %15, %14 : vector<8x128xf32>
    %cst_10 = arith.constant 5.000000e-01 : f32
    %17 = vector.broadcast %cst_10 : f32 to vector<8x128xf32>
    %18 = arith.cmpf olt, %9, %17 : vector<8x128xf32>
    %cst_11 = arith.constant 0.000000e+00 : f32
    %19 = vector.broadcast %cst_11 : f32 to vector<8x128xf32>
    %20 = arith.select %18, %16, %19 : vector<8x128xi1>, vector<8x128xf32>
    %c0_12 = arith.constant 0 : index
    %c0_13 = arith.constant 0 : index
    %21 = vector.load %arg7[%c0_12, %c0_13] : memref<8x128xf32, #tpu.memory_space<vmem>>, vector<8x128xf32>
    tpu.vector_store %arg7[%c0_12, %c0_13], %20 {strides = array<i32>} : memref<8x128xf32, #tpu.memory_space<vmem>>, vector<8x128xf32>,
    %c0_14 = arith.constant 0 : index
    %c0_15 = arith.constant 0 : index
    %22 = vector.load %arg4[%c0_14, %c0_15] : memref<8x1xi32, #tpu.memory_space<vmem>>, vector<8x1xi32>
    %23 = tpu.iota {dimensions = array<i32: 1>} : vector<8x128xi32>
    %24 = vector.broadcast %22 : vector<8x1xi32> to vector<8x128xi32>
    %25 = arith.cmpi eq, %23, %24 : vector<8x128xi32>
    %26 = arith.extui %25 : vector<8x128xi1> to vector<8x128xi32>
    %27 = arith.sitofp %26 : vector<8x128xi32> to vector<8x128xf32>
    %c0_16 = arith.constant 0 : index
    %c0_17 = arith.constant 0 : index
    %28 = vector.load %arg5[%c0_16, %c0_17] : memref<128x32xf32, #tpu.memory_space<vmem>>, vector<128x32xf32>
    %cst_18 = arith.constant dense<0.000000e+00> : vector<8x32xf32>
    %29 = tpu.matmul %27, %28, %cst_18 {dimension_numbers = #tpu.dot_dimension_numbers<[1], [0], [0], [1], [0, 0, 1, 1], [], []>} : vector<8x128xf32>, vector<128x32xf32>, vector<8x32xf32> -> vector<8x32xf32>
    %c0_19 = arith.constant 0 : index
    %c0_20 = arith.constant 0 : index
    %c0_21 = arith.constant 0 : index
    %30 = vector.load %arg8[%c0_19, %c0_20, %c0_21] : memref<1x8x32xf32, #tpu.memory_space<vmem>>, vector<1x8x32xf32>
    %31 = vector.shape_cast %30 : vector<1x8x32xf32> to vector<8x32xf32>
    %32 = vector.shape_cast %29 : vector<8x32xf32> to vector<1x8x32xf32>
    tpu.vector_store %arg8[%c0_19, %c0_20, %c0_21], %32 {strides = array<i32>} : memref<1x8x32xf32, #tpu.memory_space<vmem>>, vector<1x8x32xf32>,
    return
  }
  func.func @transform_0(%arg0: i32) -> (i32, i32) {
    %c0_i32 = arith.constant 0 : i32
    %c0_i32_0 = arith.constant 0 : i32
    return %arg0, %c0_i32 : i32, i32
  }
  func.func @transform_1(%arg0: i32) -> (i32, i32) {
    %c0_i32 = arith.constant 0 : i32
    %c0_i32_0 = arith.constant 0 : i32
    %c0_i32_1 = arith.constant 0 : i32
    return %c0_i32, %c0_i32_0 : i32, i32
  }
  func.func @transform_2(%arg0: i32) -> (i32, i32) {
    %c0_i32 = arith.constant 0 : i32
    %c0_i32_0 = arith.constant 0 : i32
    return %arg0, %c0_i32 : i32, i32
  }
  func.func @transform_3(%arg0: i32) -> (i32, i32) {
    %c0_i32 = arith.constant 0 : i32
    %c0_i32_0 = arith.constant 0 : i32
    %c0_i32_1 = arith.constant 0 : i32
    return %c0_i32, %c0_i32_0 : i32, i32
  }
  func.func @transform_4(%arg0: i32) -> (i32, i32) {
    %c0_i32 = arith.constant 0 : i32
    %c0_i32_0 = arith.constant 0 : i32
    %c0_i32_1 = arith.constant 0 : i32
    return %c0_i32, %c0_i32_0 : i32, i32
  }
  func.func @transform_5(%arg0: i32) -> (i32, i32) {
    %c0_i32 = arith.constant 0 : i32
    %c0_i32_0 = arith.constant 0 : i32
    return %arg0, %c0_i32 : i32, i32
  }
  func.func @transform_6(%arg0: i32) -> (i32, i32) {
    %c0_i32 = arith.constant 0 : i32
    %c0_i32_0 = arith.constant 0 : i32
    return %arg0, %c0_i32 : i32, i32
  }
  func.func @transform_7(%arg0: i32) -> (i32, i32, i32) {
    %c0_i32 = arith.constant 0 : i32
    %c0_i32_0 = arith.constant 0 : i32
    %c0_i32_1 = arith.constant 0 : i32
    return %arg0, %c0_i32, %c0_i32_0 : i32, i32, i32
  }
}

</mosaic_0001>

<bundles_post_ra>
// kernel: tpu_custom_call.1
= control target key start
LH: loop header
LB: loop body
LE: loop exit
PB: predicated region body
PF: predicated region fallthrough
CT: control target
= control target key end

     0   :  { %s1575_s0 = inlined_call_operand.hbm [shape: f32[256,128], index: 0, kind: input, shape index: {}]   ;;  %s1576_s1 = inlined_call_operand.vmem [shape: f32[1,128], index: 1, kind: input, shape index: {}]   ;;  %s1577_s2 = inlined_call_operand.vmem [shape: f32[16,128], index: 2, kind: input, shape index: {}]   ;;  %s1578_s3 = inlined_call_operand.vmem [shape: s32[8,1], index: 3, kind: input, shape index: {}]   ;;  %s1579_s4 = inlined_call_operand.vmem [shape: f32[128,32], index: 4, kind: input, shape index: {}]   ;;  %s1580_s5 = inlined_call_operand.hbm [shape: f32[256,128], index: 5, kind: output, shape index: {0}]   ;;  %s1581_s6 = inlined_call_operand.hbm [shape: f32[16,128], index: 6, kind: output, shape index: {1}]   ;;  %s1582_s7 = inlined_call_operand.hbm [shape: f32[2,8,32], index: 7, kind: output, shape index: {2}]  }
   0x1   :  { %1584 = sst [smem:[#allocation13_spill]] %s1575_s0 }
   0x2   :  { %1585 = sst [smem:[#allocation14_spill]] %s1576_s1 }
   0x3   :  { %13 = vsyncpa [#allocation3], 0 }
   0x4   :  { %15 = vsyncpa [#allocation3 + $0x1], 0 }
   0x5   :  { %16 = vsyncpa [#allocation4], 0 }
   0x6   :  { %18 = vsyncpa [#allocation4 + $0x1], 0 }
   0x7   :  { %19 = vsyncpa [#allocation7], 0 }
   0x8   :  { %21 = vsyncpa [#allocation7 + $0x1], 0  ;;  %s1202_s24 = smov 0   ;;  %s1204_s25 = smov 0  }
   0x9   :  { %s1206_s26 = smov 0   ;;  %s1208_s27 = smov 0  }
   0xa LB: > { %s1223_s28 = sadd.s32 4294967295, %s1148_s27   ;;  %s1583_s29 = sadd.s32 4294967294, %s1148_s27   ;;  %s1148_s27 = sphi %s1208_s27, %s1602_s27   ;;  %s1144_s26 = sphi %s1206_s26, %s1601_s26   ;;  %s1140_s25 = sphi %s1204_s25, %s1600_s25   ;;  %s1136_s24 = sphi %s1202_s24, %s1599_s24  }
   0xb   : > { %s1227_s30 = sadd.s32 1, %s1148_s27   ;;  %s34_s8 = sadd.s32 1, %s1144_s26 }
   0xc   : > { %s31_s9 = ssub.s32 %s1148_s27, %s1227_s30  ;;  %p41_p0 = scmp.ne.s32.totalorder %s1144_s26, %s1140_s25 }
   0xd   : > { %p32_p1 = scmp.eq.s32.totalorder %s31_s9, 0  ;;  %p42_p2 = scmp.eq.s32.totalorder %s1148_s27, 0 }
   0xe   : > { %p47_p3 = scmp.ne.s32.totalorder %s1140_s25, %s1136_s24  ;;  %p48_p4 = scmp.eq.s32.totalorder %s1223_s28, 0 }
   0xf   : > { %s1239_s10 = scalar_select %p32_p1, %s1144_s26, %s34_s8  }
  0x10   : > { %p1241_p5 = por %p42_p2, %p41_p0  ;;  %p1245_p6 = por %p48_p4, %p47_p3 }
  0x11   : > { %1586 = sst [smem:[#allocation12_spill]] %s1239_s10  ;;  %p160_p7 = scmp.eq.s32.totalorder %s1223_s28, 1 }
  0x12   : > { %p166_p8 = scmp.eq.s32.totalorder %s1583_s29, 1  ;;  %p912_p10 = scmp.lt.s32.totalorder %s1148_s27, 2 }
  0x13   : > { %p1254_p11 = por %p160_p7, %p41_p0  ;;  %s247_s15 = sand.u32 1, %s1144_s26  }
  0x14   : > { %p1258_p12 = por %p166_p8, %p47_p3  ;;  %s888_s16 = sshll.u32 %s1148_s27, 7 }
  0x15   : > { %s865_s17 = sshll.u32 %s247_s15, 7  ;;  %s1591_s0 = sld [smem:[#allocation13_spill]] }
  0x16   : > { %s251_s22 = scalar_lea.vmem [#allocation2], %s865_s17  ;;  %p1269_p13 = pnand %p912_p10, %p1241_p5 }
  0x17   : > { %s259_s23 = sshll.u32 %s251_s22, 4  ;;  %p868_p0 = scmp.ge.s32.totalorder %s1148_s27, 1  ;;  %s260_s23 = int_to_ptr.vmem [resolvable:$true] %s259_s23 }
  0x18   : > { %p274_p1 = scmp.lt.s32.totalorder %s1148_s27, 3  ;;  %s248_s9 = scalar_lea.sflag [#allocation3], %s247_s15 }
  0x19   : > { %p996_p3 = pneg %p1269_p13 }
  0x1b   : > { %s256_s20 = scalar_lea.hbm %s1591_s0, %s888_s16  ;;  %s999_s11 = scalar_lea.hbm %s1591_s0, 256 }
  0x1c   : > { %s257_s21 = sshll.u32 %s256_s20, 4  ;;  %s258_s21 = int_to_ptr.hbm [resolvable:$true] %s257_s21 }
  0x1d   : > { %s992_s29 = sshra.s32 %s258_s21, 4  ;;  %s993_s29 = int_to_ptr.hbm [resolvable:$true] %s992_s29 }
  0x1e   : > { %s994_s10 = scalar_lea.hbm %s993_s29, 128  ;;  %p1000_p5 = scmp.lt.s32.totalorder %s993_s29, %s1591_s0 }
  0x1f   : > { %p995_p2 = scmp.ne.s32.totalorder %s993_s29, %s994_s10  ;;  %p1001_p8 = scmp.lt.s32.totalorder %s999_s11, %s994_s10 }
  0x21   : > { %p997_p4 = pnand %p996_p3, %p995_p2  ;;  %p1002_p10 = por %p1001_p8, %p1000_p5 }
  0x23   : > { %p998_p7 = pneg %p997_p4 }
  0x25   : > { %p1003_p9 = pnand %p1002_p10, %p998_p7 }
  0x27   : > { %1006 = shalt.err (!%p1003_p9)
}
  0x28   : > { %s1150_s15 = smov 128   ;;  %s1151_s20 = smov 8  }
  0x29   : > { %901 = dma.hbm_to_vmem [thread:$0]  (!%p1269_p13), %s258_s21, 2048, %s260_s23, %s248_s9, %s1150_s15, %s1150_s15, %s1151_s20  }
  0x2a   : > { %p275_p2 = pnand %p868_p0, %p274_p1 }
  0x2b   : > { %s1290_s22 = sand.u32 (!%p275_p2), 1, %s1140_s25  }
  0x2c   : > { %278 = sbr.rel (%p275_p2) target bundleno = 297 (0x129), region = 40  ;;  %s869_s29 = sshll.u32 (!%p275_p2), %s1290_s22, 7 }
  0x2d   : > { %s281_s10 = scalar_lea.sflag (!%p275_p2), [#allocation3], %s1290_s22  ;;  %s1296_s16 = scalar_lea.vmem (!%p275_p2), [#allocation2], %s869_s29 }
  0x31   : > { %1123 = dma.done.wait (%p1245_p6), %s281_s10, 2048  }
  0x32   : > { %1125 = vsyncadd (%p1245_p6), %s281_s10, 4294965248  ;;  %v1152_v0 = vmov 0   ;;  %v613_v1 = vld [vmem:[%s1578_s3] sm:$0xff]  ;;  %v637_v2 = vld [vmem:[%s1579_s4 + $0x78] sm:$0xff]  ;;  %p331_p6 = scmp.lt.s32.totalorder %s1223_s28, 1  ;;  %v614_v20 = vlaneseq  ;;  %v1153_v27 = vmov 1.0  }
  0x33   : > { %958 = vset.pattern.permute.xlu0 %v1152_v0  ;;  %v636_v3 = vld [vmem:[%s1579_s4 + $0x70] sm:$0xff]  ;;  %638 = vmatpush.msra.mxu0 %v637_v2  ;;  %v635_v4 = vld [vmem:[%s1579_s4 + $0x68] sm:$0xff]  ;;  %v634_v5 = vld [vmem:[%s1579_s4 + $0x60] sm:$0xff]  ;;  %v1154_v32 = vmov 2102212464   ;;  %s1595_s1 = sld [smem:[#allocation14_spill]] }
  0x34   : > { %617 = vperm.xlu0 %958, %v613_v1   ;;  %v633_v6 = vld [vmem:[%s1579_s4 + $0x58] sm:$0xff]  ;;  %v632_v7 = vld [vmem:[%s1579_s4 + $0x50] sm:$0xff]  ;;  %v631_v8 = vld [vmem:[%s1579_s4 + $0x48] sm:$0xff]  ;;  %s332_s20 = scalar_select %p331_p6, %s1223_s28, 1  ;;  %v615_v23 = vand.u32 127, %v614_v20 }
  0x35   : > { %639 = vmatpush.msra.mxu0 %v636_v3  ;;  %v630_v9 = vld [vmem:[%s1579_s4 + $0x40] sm:$0xff]  ;;  %v629_v10 = vld [vmem:[%s1579_s4 + $0x38] sm:$0xff]  ;;  %v628_v11 = vld [vmem:[%s1579_s4 + $0x30] sm:$0xff]  ;;  %v1155_v36 = vmov 683565275   ;;  %s871_s11 = sshll.u32 %s1290_s22, 3 }
  0x36   : > { %v627_v12 = vld [vmem:[%s1579_s4 + $0x28] sm:$0xff]  ;;  %v626_v13 = vld [vmem:[%s1579_s4 + $0x20] sm:$0xff]  ;;  %v625_v14 = vld [vmem:[%s1579_s4 + $0x18] sm:$0xff]  ;;  %s873_s10 = sshll.u32 %s332_s20, 3  ;;  %v1156_v38 = vmov 2475754826  }
  0x37   : > { %640 = vmatpush.msra.mxu0 %v635_v4  ;;  %v624_v15 = vld [vmem:[%s1579_s4 + $0x10] sm:$0xff]  ;;  %v623_v16 = vld [vmem:[%s1579_s4 + $0x8] sm:$0xff]  ;;  %v622_v17 = vld [vmem:[%s1579_s4] sm:$0xff]  ;;  %s334_s8 = scalar_lea.vmem %s1577_s2, %s873_s10  ;;  %v1157_v41 = vmov 2131351028   ;;  %s884_s18 = sshll.u32 %s1223_s28, 3 }
  0x38   : > { %v1359_v18 = vld [vmem:[%s334_s8] sm:$0xff]  ;;  %v1158_v47 = vmov 920167782   ;;  %v1159_v53 = vmov 1326507024   ;;  %s1463_s15 = scalar_lea.hbm %s1581_s6, %s884_s18  ;;  %s665_s20 = sand.u32 1, %s1223_s28  }
  0x39   : > { %641 = vmatpush.msra.mxu0 %v634_v5  ;;  %v1362_v19 = vmul.f32 6.2831855, %v1359_v18  ;;  %s322_s10 = scalar_lea.vmem [#allocation6], %s871_s11  ;;  %s702_s23 = sshll.u32 %s1463_s15, 4  ;;  %s703_s23 = int_to_ptr.hbm [resolvable:$true] %s702_s23 }
  0x3a   : > { %s700_s21 = sshll.u32 %s322_s10, 4  ;;  %s1036_s8 = sshra.s32 %s703_s23, 4  ;;  %s1477_s21 = int_to_ptr.vmem [resolvable:$true] %s700_s21  ;;  %s1037_s8 = int_to_ptr.hbm [resolvable:$true] %s1036_s8 }
  0x3b   : > { %642 = vmatpush.msra.mxu0 %v633_v6  ;;  %v457_v21 = vand.u32 2139095040, %v1362_v19  ;;  %v454_v31 = vand.u32 2147483647, %v1362_v19  ;;  %vm456_vm13 = vcmp.lt.s32.totalorder %v1362_v19, 0  ;;  %s1038_s9 = scalar_lea.hbm %s1037_s8, 8  ;;  %s1042_s19 = scalar_lea.hbm %s1581_s6, 16 }
  0x3c   : > { %p1039_p9 = scmp.ne.s32.totalorder %s1037_s8, %s1038_s9  ;;  %p1043_p1 = scmp.lt.s32.totalorder %s1037_s8, %s1581_s6 }
  0x3d   : > { %643 = vmatpush.msra.mxu0 %v632_v7  ;;  %v458_v22 = vshrl.u32 %v457_v21, 23  ;;  %v461_v34 = vand.u32 8388607, %v454_v31  ;;  %vm1413_vm14 = vcmp.le.f32.partialorder %v454_v31, 0.7853982  ;;  %p1044_p3 = scmp.lt.s32.totalorder %s1042_s19, %s1038_s9 }
  0x3e   : > { %p1040_p13 = pnand %p1039_p9, %p1254_p11 }
  0x3f   : > { %644 = vmatpush.msra.mxu0 %v631_v8  ;;  %v874_v24 = vadd.s32 4294967169, %v458_v22  ;;  %v462_v45 = vor.u32 8388608, %v461_v34  ;;  %p1045_p4 = por %p1044_p3, %p1043_p1 }
  0x40   : > { %p1041_p0 = pneg %p1040_p13 }
  0x41   : > { %645 = vmatpush.msra.mxu0 %v630_v9  ;;  %v464_v26 = vadd.s32 1, %v874_v24  ;;  %v502_v56 = vshll.u32 %v462_v45, 8 }
  0x42   : > { %p1046_p7 = pnand %p1045_p4, %p1041_p0 }
  0x43   : > { %646 = vmatpush.msra.mxu0 %v629_v10  ;;  %vm465_vm1 = vcmp.gt.s32.totalorder %v464_v26, 0  ;;  %v503_v61 = vand.u32 65535, %v502_v56  ;;  %v504_v1 = vshrl.u32 %v502_v56, 16 }
  0x44   : > { %v466_v28 = vsel %vm465_vm1, %v464_v26, 0 }
  0x45   : > { %647 = vmatpush.msra.mxu0 %v628_v11  ;;  %v468_v29 = vand.u32 31, %v466_v28  ;;  %v1370_v35 = vshrl.u32 %v466_v28, 5 }
  0x47   : > { %648 = vmatpush.msra.mxu0 %v627_v12  ;;  %v1365_v30 = vsub.s32 32, %v468_v29  ;;  %v480_v33 = vshll.u32 %v1154_v32, %v468_v29  ;;  %v471_v37 = vshll.u32 %v1155_v36, %v468_v29  ;;  %v474_v40 = vshll.u32 %v1156_v38, %v468_v29 }
  0x48   : > { %v477_v43 = vshll.u32 %v1157_v41, %v468_v29  ;;  %v483_v49 = vshll.u32 %v1158_v47, %v468_v29  ;;  %vm486_vm2 = vcmp.lt.s32.totalorder %v1370_v35, 1  ;;  %vm488_vm3 = vcmp.lt.s32.totalorder %v1370_v35, 3 }
  0x49   : > { %649 = vmatpush.msra.mxu0 %v626_v13  ;;  %v472_v39 = vshrl.u32 %v1156_v38, %v1365_v30  ;;  %v475_v42 = vshrl.u32 %v1157_v41, %v1365_v30  ;;  %v478_v44 = vshrl.u32 %v1154_v32, %v1365_v30  ;;  %v481_v48 = vshrl.u32 %v1158_v47, %v1365_v30 }
  0x4a   : > { %v484_v54 = vshrl.u32 %v1159_v53, %v1365_v30  ;;  %vm487_vm4 = vcmp.lt.s32.totalorder %v1370_v35, 2  ;;  %vm489_vm5 = vcmp.lt.s32.totalorder %v1370_v35, 4 }
  0x4b   : > { %650 = vmatpush.msra.mxu0 %v625_v14  ;;  %v473_v46 = vor.u32 %v472_v39, %v471_v37  ;;  %v476_v50 = vor.u32 %v475_v42, %v474_v40  ;;  %v479_v51 = vor.u32 %v478_v44, %v477_v43  ;;  %v482_v52 = vor.u32 %v481_v48, %v480_v33 }
  0x4c   : > { %v485_v57 = vor.u32 %v484_v54, %v483_v49 }
  0x4d   : > { %651 = vmatpush.msra.mxu0 %v624_v15  ;;  %v494_v55 = vsel %vm486_vm2, %v473_v46, %v476_v50  ;;  %v495_v58 = vsel %vm489_vm5, %v482_v52, 920167782  ;;  %v498_v60 = vsel %vm486_vm2, %v476_v50, %v479_v51  ;;  %v491_v32 = vsel %vm489_vm5, %v479_v51, 2102212464 }
  0x4e   : > { %v496_v59 = vsel %vm488_vm3, %v479_v51, %v495_v58  ;;  %v499_v63 = vsel %vm489_vm5, %v485_v57, 1326507024  ;;  %v492_v39 = vsel %vm488_vm3, %v476_v50, %v491_v32 }
  0x4f   : > { %652 = vmatpush.msra.mxu0 %v623_v16  ;;  %v497_v62 = vsel %vm487_vm4, %v494_v55, %v496_v59  ;;  %v500_v2 = vsel %vm488_vm3, %v482_v52, %v499_v63  ;;  %vm610_vm3 = vcmp.lt.f32.partialorder %v1359_v18, 0.5 }
  0x50   : > { %v527_v3 = vand.u32 65535, %v497_v62  ;;  %v528_v4 = vshrl.u32 %v497_v62, 16  ;;  %v501_v5 = vsel %vm487_vm4, %v498_v60, %v500_v2 }
  0x51   : > { %653 = vmatpush.msra.mxu0 %v622_v17  ;;  %v505_v6 = vand.u32 65535, %v501_v5  ;;  %v506_v7 = vshrl.u32 %v501_v5, 16 }
  0x52   : > { %v530_v8 = vmul.u32 %v528_v4, %v503_v61  ;;  %v529_v9 = vmul.u32 %v527_v3, %v503_v61  ;;  %v531_v10 = vmul.u32 %v527_v3, %v504_v1  ;;  %v532_v14 = vmul.u32 %v528_v4, %v504_v1 }
  0x53   : > { %v507_v11 = vmul.u32 %v505_v6, %v503_v61  ;;  %v508_v12 = vmul.u32 %v506_v7, %v503_v61  ;;  %v509_v13 = vmul.u32 %v505_v6, %v504_v1  ;;  %v510_v17 = vmul.u32 %v506_v7, %v504_v1 }
  0x54   : > { %v533_v15 = vshll.u32 %v530_v8, 16  ;;  %v535_v16 = vshll.u32 %v531_v10, 16  ;;  %v534_v34 = vshrl.u32 %v530_v8, 16 }
  0x55   : > { %v511_v20 = vshll.u32 %v508_v12, 16  ;;  %v513_v21 = vshll.u32 %v509_v13, 16  ;;  %v512_v28 = vshrl.u32 %v508_v12, 16  ;;  %v514_v40 = vshrl.u32 %v509_v13, 16 }
  0x56   : > { %vm537_vm6 = vc.u32 %v529_v9, %v533_v15  ;;  %v539_v22 = vadd.s32 %v533_v15, %v529_v9 }
  0x57   : > { %vm515_vm7 = vc.u32 %v507_v11, %v511_v20  ;;  %v538_v24 = vsel %vm537_vm6, 1, %v1152_v0 }
  0x58   : > { %v540_v26 = vadd.s32 %v538_v24, %v532_v14  ;;  %vm541_vm8 = vc.u32 %v539_v22, %v535_v16  ;;  %v543_v43 = vadd.s32 %v539_v22, %v535_v16  ;;  %v1423_v22 = vld [vmem:[%s1595_s1] ss:$0 sm:$0xff] }
  0x59   : > { %v542_v37 = vsel %vm541_vm8, 1, %v1152_v0 }
  0xa6   : > { %v618_v25 = vpop.permute.xlu0 %617 }
  0xa7   : > { %vm619_vm0 = vcmp.eq.s32.totalorder %v615_v23, %v618_v25  ;;  %v517_v23 = vadd.s32 %v511_v20, %v507_v11  ;;  %v516_v25 = vsel %vm515_vm7, 1, %v1152_v0 }
  0xa8   : > { %878 = vmatmul.msk.f32.vlgmr.msra.gmra.mxu0 %vm619_vm0, %v1153_v27  ;;  %v470_v27 = vshrl.u32 %v1155_v36, %v1365_v30  ;;  %v518_v29 = vadd.s32 %v516_v25, %v510_v17  ;;  %v536_v30 = vshrl.u32 %v531_v10, 16  ;;  %v544_v36 = vadd.s32 %v542_v37, %v540_v26  ;;  %v336_v26 = vld [vmem:[%s1296_s16] sm:$0xff] }
  0xa9   : > { %vm519_vm9 = vc.u32 %v517_v23, %v513_v21  ;;  %v340_v37 = vld [vmem:[%s1296_s16 + $0x20] sm:$0xff] }
  0xaa   : > { %v520_v33 = vsel %vm519_vm9, 1, %v1152_v0  ;;  %v490_v38 = vsel %vm486_vm2, %v470_v27, %v473_v46  ;;  %v545_v45 = vadd.s32 %v544_v36, %v534_v34  ;;  %v339_v34 = vld [vmem:[%s1296_s16 + $0x18] sm:$0xff]  ;;  %vm597_vm2 = vweird.f32 %v1362_v19 }
  0xab   : > { %v522_v41 = vadd.s32 %v520_v33, %v518_v29  ;;  %v493_v44 = vsel %vm487_vm4, %v490_v38, %v492_v39  ;;  %v338_v29 = vld [vmem:[%s1296_s16 + $0x10] sm:$0xff]  ;;  %v341_v38 = vld [vmem:[%s1296_s16 + $0x28] sm:$0xff] }
  0xac   : > { %v546_v48 = vadd.s32 %v545_v45, %v536_v30  ;;  %v547_v49 = vmul.u32 %v502_v56, %v493_v44  ;;  %v342_v39 = vld [vmem:[%s1296_s16 + $0x30] sm:$0xff]  ;;  %v358_v45 = vsub.f32 %v338_v29, %v1423_v22 }
  0xad   : > { %v523_v42 = vadd.s32 %v522_v41, %v512_v28  ;;  %v337_v28 = vld [vmem:[%s1296_s16 + $0x8] sm:$0xff]  ;;  %v356_v41 = vsub.f32 %v336_v26, %v1423_v22 }
  0xae   : > { %v550_v0 = vadd.s32 1, %v546_v48  ;;  %v357_v44 = vsub.f32 %v337_v28, %v1423_v22 }
  0xaf   : > { %v524_v47 = vadd.s32 %v523_v42, %v514_v40  ;;  %v343_v40 = vld [vmem:[%s1296_s16 + $0x38] sm:$0xff]  ;;  %v344_v42 = vld [vmem:[%s1296_s16 + $0x40] sm:$0xff] }
  0xb1   : > { %vm549_vm10 = vc.u32 %v524_v47, %v543_v43  ;;  %v548_v60 = vadd.s32 %v543_v43, %v524_v47  ;;  %v345_v43 = vld [vmem:[%s1296_s16 + $0x48] sm:$0xff]  ;;  %v359_v47 = vsub.f32 %v339_v34, %v1423_v22 }
  0xb2   : > { %v551_v51 = vsel %vm549_vm10, %v550_v0, %v546_v48  ;;  %v360_v48 = vsub.f32 %v340_v37, %v1423_v22 }
  0xb3   : > { %v552_v46 = vadd.s32 %v551_v51, %v547_v49  ;;  %v361_v49 = vsub.f32 %v341_v38, %v1423_v22 }
  0xb5   : > { %v553_v52 = vadd.s32 536870912, %v552_v46 }
  0xb7   : > { %v554_v53 = vshrl.u32 %v553_v52, 30  ;;  %v362_v52 = vsub.f32 %v342_v39, %v1423_v22 }
  0xb9   : > { %v555_v50 = vshll.u32 %v554_v53, 30  ;;  %v578_v31 = vsub.s32 4, %v554_v53 }
  0xbb   : > { %v556_v54 = vsub.s32 %v552_v46, %v555_v50  ;;  %v579_v21 = vsel %vm456_vm13, %v578_v31, %v554_v53  ;;  %v346_v46 = vld [vmem:[%s1296_s16 + $0x50] sm:$0xff]  ;;  %v363_v53 = vsub.f32 %v343_v40, %v1423_v22  ;;  %v347_v50 = vld [vmem:[%s1296_s16 + $0x58] sm:$0xff] }
  0xbc   : > { %v581_v23 = vsel %vm1413_vm14, 0, %v579_v21 }
  0xbd   : > { %vm557_vm11 = vcmp.lt.s32.totalorder %v556_v54, 0  ;;  %v558_v55 = vsub.s32 0, %v556_v54  ;;  %v598_v27 = vand.u32 3, %v581_v23 }
  0xbf   : > { %v559_v57 = vsel %vm557_vm11, %v558_v55, %v556_v54  ;;  %vm603_vm15 = vcmp.eq.s32.totalorder %v598_v27, 2  ;;  %vm599_vm0 = vcmp.lt.s32.totalorder %v598_v27, 2  ;;  %vm600_vm1 = vcmp.eq.s32.totalorder %v598_v27, 0 }
  0xc0   : > { %v560_v58 = vclz %v559_v57  ;;  %v364_v55 = vsub.f32 %v344_v42, %v1423_v22  ;;  %v365_v57 = vsub.f32 %v345_v43, %v1423_v22 }
  0xc2   : > { %v875_v59 = vadd.s32 4294967294, %v560_v58 }
  0xc4   : > { %vm876_vm12 = vcmp.lt.s32.totalorder %v875_v59, 0 }
  0xc5   : > { %v563_v35 = vsel %vm876_vm12, 0, %v875_v59 }
  0xc6   : > { %v564_v61 = vsub.s32 32, %v563_v35  ;;  %v565_v62 = vshll.u32 %v556_v54, %v563_v35  ;;  %v568_v63 = vsub.s32 4294967266, %v563_v35  ;;  %v348_v54 = vld [vmem:[%s1296_s16 + $0x60] sm:$0xff]  ;;  %v350_v35 = vld [vmem:[%s1296_s16 + $0x70] sm:$0xff] }
  0xc7   : > { %v370_v8 = vsub.f32 %v350_v35, %v1423_v22 }
  0xc8   : > { %v566_v56 = vshrl.u32 %v548_v60, %v564_v61  ;;  %v569_v1 = vadd.s32 127, %v568_v63  ;;  %v349_v60 = vld [vmem:[%s1296_s16 + $0x68] sm:$0xff]  ;;  %v372_v61 = vmul.f32 %v356_v41, %v356_v41  ;;  %v366_v63 = vsub.f32 %v346_v46, %v1423_v22 }
  0xca   : > { %v567_v2 = vor.u32 %v566_v56, %v565_v62  ;;  %v570_v3 = vshll.u32 %v569_v1, 23  ;;  %v373_v62 = vmul.f32 %v357_v44, %v357_v44  ;;  %v374_v56 = vmul.f32 %v358_v45, %v358_v45 }
  0xcb   : > { %v375_v1 = vmul.f32 %v359_v47, %v359_v47 }
  0xcc   : > { %v571_v4 = vor.u32 4788187, %v570_v3  ;;  %v574_v5 = vcvt.s32.f32 %v567_v2  ;;  %v367_v3 = vsub.f32 %v347_v50, %v1423_v22 }
  0xcd   : > { %v391_v31 = vmul.f32 -512.0, %v375_v1 }
  0xce   : > { %v572_v6 = vand.u32 2147483647, %v571_v4  ;;  %v368_v4 = vsub.f32 %v348_v54, %v1423_v22  ;;  %v383_v27 = vmul.f32 %v367_v3, %v367_v3 }
  0xcf   : > { %v410_v37 = vmul.f32 1.442695, %v391_v31 }
  0xd0   : > { %v575_v7 = vmul.f32 %v574_v5, %v572_v6  ;;  %v376_v5 = vmul.f32 %v360_v48, %v360_v48  ;;  %v351_v6 = vld [vmem:[%s1296_s16 + $0x78] sm:$0xff]  ;;  %s1481_s16 = scalar_lea.sflag [#allocation7], %s665_s20 }
  0xd2   : > { %v576_v9 = vxor.u32 2147483648, %v575_v7  ;;  %v392_v21 = vmul.f32 -512.0, %v376_v5 }
  0xd4   : > { %v577_v10 = vsel %vm456_vm13, %v576_v9, %v575_v7  ;;  %v369_v7 = vsub.f32 %v349_v60, %v1423_v22  ;;  %v377_v9 = vmul.f32 %v361_v49, %v361_v49  ;;  %v412_v39 = vmul.f32 1.442695, %v392_v21 }
  0xd5   : > { %v580_v11 = vsel %vm1413_vm14, %v1362_v19, %v577_v10 }
  0xd6   : > { %v582_v12 = vmul.f32 %v580_v11, %v580_v11  ;;  %v393_v26 = vmul.f32 -512.0, %v377_v9 }
  0xd8   : > { %v583_v13 = vmul.f32 -0.001358992, %v582_v12  ;;  %v590_v14 = vmul.f32 -0.00019511016, %v582_v12 }
  0xda   : > { %v584_v15 = vadd.f32 0.041655596, %v583_v13  ;;  %v591_v16 = vadd.f32 0.008332121, %v590_v14  ;;  %v389_v13 = vmul.f32 -512.0, %v373_v62 }
  0xdc   : > { %v585_v17 = vmul.f32 %v584_v15, %v582_v12  ;;  %v592_v20 = vmul.f32 %v591_v16, %v582_v12  ;;  %v379_v15 = vmul.f32 %v363_v53, %v363_v53  ;;  %v390_v16 = vmul.f32 -512.0, %v374_v56 }
  0xde   : > { %v586_v24 = vadd.f32 -0.4999988, %v585_v17  ;;  %v593_v25 = vadd.f32 -0.16666654, %v592_v20  ;;  %v371_v17 = vsub.f32 %v351_v6, %v1423_v22  ;;  %v380_v20 = vmul.f32 %v364_v55, %v364_v55 }
  0xdf   : > { %v395_v34 = vmul.f32 -512.0, %v379_v15  ;;  %v408_v18 = vmul.f32 1.442695, %v390_v16  ;;  %v384_v22 = vmul.f32 %v368_v4, %v368_v4 }
  0xe0   : > { %v587_v32 = vmul.f32 %v586_v24, %v582_v12  ;;  %v594_v33 = vmul.f32 %v593_v25, %v582_v12  ;;  %v388_v12 = vmul.f32 -512.0, %v372_v61  ;;  %v381_v24 = vmul.f32 %v365_v57, %v365_v57 }
  0xe1   : > { %v382_v25 = vmul.f32 %v366_v63, %v366_v63  ;;  %v396_v38 = vmul.f32 -512.0, %v380_v20 }
  0xe2   : > { %v588_v30 = vadd.f32 1.0, %v587_v32  ;;  %v595_v36 = vadd.f32 1.0, %v594_v33  ;;  %v404_v29 = vmul.f32 1.442695, %v388_v12  ;;  %v406_v32 = vmul.f32 1.442695, %v389_v13 }
  0xe4   : > { %v596_v0 = vmul.f32 %v595_v36, %v580_v11  ;;  %v604_v51 = vxor.u32 2147483648, %v588_v30  ;;  %v378_v11 = vmul.f32 %v362_v52, %v362_v52  ;;  %960 = vpow2.f32 %v404_v29 }
  0xe6   : > { %v601_v58 = vxor.u32 2147483648, %v596_v0  ;;  %v605_v59 = vsel %vm603_vm15, %v604_v51, %v596_v0  ;;  %v394_v28 = vmul.f32 -512.0, %v378_v11 }
  0xe8   : > { %v602_v2 = vsel %vm600_vm1, %v588_v30, %v601_v58 }
  0xe9   : > { %v606_v19 = vsel %vm599_vm0, %v602_v2, %v605_v59 }
  0xea   : > { %v607_v10 = vsel %vm597_vm2, nan, %v606_v19 }
  0xeb   : > { %v608_v14 = vadd.f32 1.0, %v607_v10 }
  0xed   : > { %v609_v23 = vmul.f32 0.5, %v608_v14 }
  0xef   : > { %v611_v33 = vsel %vm610_vm3, %v609_v23, 0.0 }
  0xf0   : > { %612 = vst [vmem:[%s322_s10] sm:$0xff] %v611_v33 }
  0xf1   : > { %1049 = shalt.err (!%p1046_p7)
}
  0xf2   : > { %893 = dma.vmem_to_hbm [thread:$0]  (%p1254_p11), %s1477_s21, 128, %s703_s23, %s1481_s16   ;;  %v385_v40 = vmul.f32 %v369_v7, %v369_v7  ;;  %v397_v41 = vmul.f32 -512.0, %v381_v24  ;;  %962 = vpow2.f32 %v406_v32  ;;  %v414_v30 = vmul.f32 1.442695, %v393_v26  ;;  %v961_v46 = vpop.eup %960 }
  0xf3   : > { %v386_v36 = vmul.f32 %v370_v8, %v370_v8  ;;  %v398_v42 = vmul.f32 -512.0, %v382_v25  ;;  %964 = vpow2.f32 %v408_v18  ;;  %v416_v43 = vmul.f32 1.442695, %v394_v28  ;;  %s1497_s20 = scalar_lea.vmem [#allocation5], %s869_s29  ;;  %s889_s29 = sshll.u32 %s1223_s28, 7 }
  0xf4   : > { %v387_v44 = vmul.f32 %v371_v17, %v371_v17  ;;  %v399_v45 = vmul.f32 -512.0, %v383_v27  ;;  %966 = vpow2.f32 %v410_v37  ;;  %v418_v47 = vmul.f32 1.442695, %v395_v34  ;;  %436 = vst [vmem:[%s1497_s20] sm:$0xff] %v961_v46  ;;  %s682_s8 = scalar_lea.hbm %s1580_s5, %s889_s29  ;;  %s683_s9 = sshll.u32 %s1497_s20, 4  ;;  %s1524_s9 = int_to_ptr.vmem [resolvable:$true] %s683_s9 }
  0xf5   : > { %v400_v48 = vmul.f32 -512.0, %v384_v22  ;;  %968 = vpow2.f32 %v412_v39  ;;  %v420_v49 = vmul.f32 1.442695, %v396_v38  ;;  %v401_v0 = vmul.f32 -512.0, %v385_v40  ;;  %s685_s17 = sshll.u32 %s682_s8, 4  ;;  %s1520_s15 = scalar_lea.hbm %s1582_s7, %s884_s18  ;;  %s686_s17 = int_to_ptr.hbm [resolvable:$true] %s685_s17 }
  0xf6   : > { %970 = vpow2.f32 %v414_v30  ;;  %v422_v51 = vmul.f32 1.442695, %v397_v41  ;;  %v402_v52 = vmul.f32 -512.0, %v386_v36  ;;  %v424_v53 = vmul.f32 1.442695, %v398_v42  ;;  %s329_s10 = scalar_lea.vmem [#allocation8], %s871_s11 }
  0xf7   : > { %972 = vpow2.f32 %v416_v43  ;;  %v403_v54 = vmul.f32 -512.0, %v387_v44  ;;  %v426_v55 = vmul.f32 1.442695, %v399_v45  ;;  %v428_v58 = vmul.f32 1.442695, %v400_v48  ;;  %s714_s28 = sshll.u32 %s329_s10, 4  ;;  %s715_s28 = int_to_ptr.vmem [resolvable:$true] %s714_s28 }
  0xf8   : > { %v963_v50 = vpop.eup %962  ;;  %974 = vpow2.f32 %v418_v47  ;;  %v430_v60 = vmul.f32 1.442695, %v401_v0  ;;  %v432_v61 = vmul.f32 1.442695, %v402_v52  ;;  %s716_s29 = sshll.u32 %s1520_s15, 4  ;;  %s661_s21 = scalar_lea.sflag [#allocation4], %s1290_s22  ;;  %s717_s29 = int_to_ptr.hbm [resolvable:$true] %s716_s29 }
  0xf9   : > { %v965_v57 = vpop.eup %964  ;;  %976 = vpow2.f32 %v420_v49  ;;  %437 = vst [vmem:[%s1497_s20 + $0x8] sm:$0xff] %v963_v50  ;;  %v434_v63 = vmul.f32 1.442695, %v403_v54  ;;  %s1064_s18 = sshra.s32 %s686_s17, 4  ;;  %s1070_s19 = scalar_lea.hbm %s1580_s5, 256  ;;  %s1065_s18 = int_to_ptr.hbm [resolvable:$true] %s1064_s18 }
  0xfa   : > { %v967_v59 = vpop.eup %966  ;;  %978 = vpow2.f32 %v422_v51  ;;  %438 = vst [vmem:[%s1497_s20 + $0x10] sm:$0xff] %v965_v57  ;;  %s1066_s23 = scalar_lea.hbm %s1065_s18, 128  ;;  %p1071_p2 = scmp.lt.s32.totalorder %s1065_s18, %s1580_s5 }
  0xfb   : > { %v969_v35 = vpop.eup %968  ;;  %980 = vpow2.f32 %v424_v53  ;;  %439 = vst [vmem:[%s1497_s20 + $0x18] sm:$0xff] %v967_v59  ;;  %p1067_p5 = scmp.ne.s32.totalorder %s1065_s18, %s1066_s23  ;;  %p1072_p6 = scmp.lt.s32.totalorder %s1070_s19, %s1066_s23 }
  0xfc   : > { %v971_v62 = vpop.eup %970  ;;  %982 = vpow2.f32 %v426_v55  ;;  %440 = vst [vmem:[%s1497_s20 + $0x20] sm:$0xff] %v969_v35 }
  0xfd   : > { %v973_v56 = vpop.eup %972  ;;  %984 = vpow2.f32 %v428_v58  ;;  %441 = vst [vmem:[%s1497_s20 + $0x28] sm:$0xff] %v971_v62  ;;  %p1068_p8 = pnand %p1067_p5, %p1254_p11  ;;  %p1073_p9 = por %p1072_p6, %p1071_p2 }
  0xfe   : > { %v975_v1 = vpop.eup %974  ;;  %986 = vpow2.f32 %v430_v60  ;;  %442 = vst [vmem:[%s1497_s20 + $0x30] sm:$0xff] %v973_v56 }
  0xff   : > { %v977_v2 = vpop.eup %976  ;;  %988 = vpow2.f32 %v432_v61  ;;  %443 = vst [vmem:[%s1497_s20 + $0x38] sm:$0xff] %v975_v1  ;;  %p1069_p10 = pneg %p1068_p8 }
 0x100   : > { %v979_v3 = vpop.eup %978  ;;  %990 = vpow2.f32 %v434_v63  ;;  %444 = vst [vmem:[%s1497_s20 + $0x40] sm:$0xff] %v977_v2 }
 0x101   : > { %v981_v4 = vpop.eup %980  ;;  %445 = vst [vmem:[%s1497_s20 + $0x48] sm:$0xff] %v979_v3  ;;  %p1074_p13 = pnand %p1073_p9, %p1069_p10 }
 0x102   : > { %v983_v5 = vpop.eup %982  ;;  %446 = vst [vmem:[%s1497_s20 + $0x50] sm:$0xff] %v981_v4 }
 0x103   : > { %v985_v19 = vpop.eup %984  ;;  %447 = vst [vmem:[%s1497_s20 + $0x58] sm:$0xff] %v983_v5 }
 0x104   : > { %v987_v6 = vpop.eup %986  ;;  %448 = vst [vmem:[%s1497_s20 + $0x60] sm:$0xff] %v985_v19 }
 0x105   : > { %v989_v7 = vpop.eup %988  ;;  %449 = vst [vmem:[%s1497_s20 + $0x68] sm:$0xff] %v987_v6 }
 0x106   : > { %v991_v8 = vpop.eup %990  ;;  %450 = vst [vmem:[%s1497_s20 + $0x70] sm:$0xff] %v989_v7 }
 0x107   : > { %451 = vst [vmem:[%s1497_s20 + $0x78] sm:$0xff] %v991_v8 }
 0x108   : > { %1077 = shalt.err (!%p1074_p13)
}
 0x109   : > { %s1160_s22 = smov 128   ;;  %s1161_s11 = smov 8   ;;  %vm658_vm4 = vcmask 261120  }
 0x10a   : > { %892 = dma.vmem_to_hbm [thread:$0]  (%p1254_p11), %s1524_s9, 2048, %s686_s17, %s661_s21, %s1160_s22, %s1160_s22, %s1161_s11  }
 0x10b   : > { %s1092_s20 = sshra.s32 %s717_s29, 4  ;;  %s1098_s18 = scalar_lea.hbm %s1582_s7, 16  ;;  %s1093_s20 = int_to_ptr.hbm [resolvable:$true] %s1092_s20 }
 0x10c   : > { %s1094_s0 = scalar_lea.hbm %s1093_s20, 8  ;;  %p1099_p4 = scmp.lt.s32.totalorder %s1093_s20, %s1582_s7 }
 0x10d   : > { %p1095_p0 = scmp.ne.s32.totalorder %s1093_s20, %s1094_s0  ;;  %p1100_p7 = scmp.lt.s32.totalorder %s1098_s18, %s1094_s0 }
 0x10f   : > { %p1096_p1 = pnand %p1095_p0, %p1254_p11  ;;  %p1101_p5 = por %p1100_p7, %p1099_p4 }
 0x111   : > { %p1097_p3 = pneg %p1096_p1 }
 0x113   : > { %p1102_p8 = pnand %p1101_p5, %p1097_p3 }
 0x125   : > { %v655_v9 = vpop.f32.mrf.mxu0 }
 0x126   : > { %659 = vst.msk [vmem:[%s329_s10] sm:$0xff] %vm658_vm4, %v655_v9 }
 0x127   : > { %1105 = shalt.err (!%p1102_p8)
}
 0x128   : > { %894 = dma.vmem_to_hbm [thread:$0]  (%p1254_p11), %s715_s28, 128, %s717_s29, %s1481_s16  }
 0x129 PF: > { %s728_s9 = sand.u32 1, %s1136_s24   ;;  %p1596_p10 = scmp.ge.s32.totalorder %s1148_s27, 2 }
 0x12a   : > { %s729_s17 = scalar_lea.sflag [#allocation4], %s728_s9 }
 0x12b   : > { %p903_p2 = pnand %p1596_p10, %p1258_p12 }
 0x12d   : > { %p904_p6 = pneg %p903_p2 }
 0x12f   : > { %1127 = dma.done.wait (%p904_p6), %s729_s17, 2048  }
 0x130   : > { %1129 = vsyncadd (%p904_p6), %s729_s17, 4294965248  ;;  %s1597_s10 = sadd.s32 4294967294, %s1148_s27  }
 0x131   : > { %s738_s21 = sand.u32 1, %s1597_s10  }
 0x132   : > { %s739_s12 = scalar_lea.sflag [#allocation7], %s738_s21 }
 0x133   : > { %1131 = dma.done.wait (%p904_p6), %s739_s12, 256  }
 0x134   : > { %1133 = vsyncadd (%p904_p6), %s739_s12, 4294967040  ;;  %s1598_s13 = sld [smem:[#allocation12_spill]]  ;;  %p24_p11 = scmp.ge.s32.totalorder %s1227_s30, 4  }
 0x135   : > { %s1599_s24 = smov %s1140_s25  ;;  %s1600_s25 = smov %s1144_s26 }
 0x136   : > { %s1602_s27 = smov %s1227_s30  ;;  %26 = sbr.rel (!%p24_p11) target bundleno = 10 (0xa), region = 120 }
 0x13a   : > { %s1601_s26 = smov %s1598_s13 }
 0x13b   :  { %755 = vsyncpa [#allocation3], 1 }
 0x13c   :  { %757 = vsyncpa [#allocation3 + $0x1], 1 }
 0x13d   :  { %758 = vsyncpa [#allocation4], 1 }
 0x13e   :  { %760 = vsyncpa [#allocation4 + $0x1], 1 }
 0x13f   :  { %761 = vsyncpa [#allocation7], 1 }
 0x140   :  { %763 = vsyncpa [#allocation7 + $0x1], 1 }

</bundles_post_ra>
